<compile_context>
chip_gen: v5e
topology: v5e:2x2
jax: 0.10.0
libtpu: 0.0.40
codegen_flags: <defaults>
</compile_context>

<pallas_src>
import functools

import jax
import jax.numpy as jnp
from jax.experimental import pallas as pl
from jax.experimental.pallas import tpu as pltpu


def _choose_split(kernel_size):
    """Width of the stage-1 partial sliding sums.

    Forced to 8 (a sublane multiple) once k >= 8 so every stage-2 group offset
    (m*8) and the residual offset 8*(k//8) is sublane-aligned.
    """
    return 8 if kernel_size >= 8 else kernel_size


def _vmem_capacity_bytes():
    try:
        return int(pltpu.get_tpu_info().vmem_capacity_bytes)
    except Exception:
        return 64 * 1024 * 1024  # v7x per-TensorCore VMEM (tightest generation)


def _pick_lane_tile(n_lanes, per_lane_bytes, budget_bytes):
    """Largest lane tile (multiple of 128) whose per-step footprint fits the
    budget, capped so n >= 256 always yields >= 2 grid steps (both v7x cores)."""
    if n_lanes <= 128:
        return n_lanes
    tn = (budget_bytes // max(per_lane_bytes, 1)) // 128 * 128
    tn = max(128, min(tn, 8192))
    if n_lanes >= 256:
        half = -(-n_lanes // 2)                      # cdiv(n, 2)
        half = ((half + 127) // 128) * 128           # round up to 128 lanes
        tn = min(tn, half)
    return n_lanes if n_lanes <= tn else tn


def _moving_avg_kernel(x_ref, out_ref, xp_ref, part_ref, *, kernel_size, pad,
                       split_a):
    # x_ref   : (L, tn)               input tile (time on sublanes, B*C on lanes)
    # out_ref : (out_len, tn)         moving-average output tile
    # xp_ref  : (pad + L + pad, tn)   f32 scratch: edge-replicate-padded tile
    # part_ref: (la, tn)              f32 scratch: width-`split_a` partial sums
    seq_len, tn = x_ref.shape
    out_len = out_ref.shape[0]
    la = part_ref.shape[0]

    # Build the replicate-padded tile in VMEM with BULK stores only
    # (x is read from HBM exactly once; no per-row store loop).
    xp_ref[pl.ds(pad, seq_len), :] = x_ref[...].astype(jnp.float32)
    if pad > 0:
        row0 = x_ref[pl.ds(0, 1), :].astype(jnp.float32)
        xp_ref[pl.ds(0, pad), :] = jnp.broadcast_to(row0, (pad, tn))
        rowl = x_ref[pl.ds(seq_len - 1, 1), :].astype(jnp.float32)
        xp_ref[pl.ds(pad + seq_len, pad), :] = jnp.broadcast_to(rowl, (pad, tn))

    # Stage 1: width-`split_a` partial sliding sums (f32 accumulation).
    acc = xp_ref[pl.ds(0, la), :]
    for i in range(1, split_a):
        acc = acc + xp_ref[pl.ds(i, la), :]
    part_ref[...] = acc

    # Stage 2: combine k // split_a partials (+ residual rows) -> width-k sums.
    # All group slice starts are multiples of split_a == 8 -> sublane-aligned.
    num_groups = kernel_size // split_a
    acc = part_ref[pl.ds(0, out_len), :]
    for m in range(1, num_groups):
        acc = acc + part_ref[pl.ds(m * split_a, out_len), :]
    for j in range(split_a * num_groups, kernel_size):
        acc = acc + xp_ref[pl.ds(j, out_len), :]

    out_ref[...] = (acc * (1.0 / kernel_size)).astype(out_ref.dtype)
    # TODO(synk): on v7x the stage-1/2 reduction could move to the otherwise-idle
    # MXU as a banded (out_len x p_len) matmul once the band is blocked over time.


def _moving_avg_xla(x, kernel_size):
    """Pure-XLA path for lane-sparse inputs (B*C < 128) or over-long sequences."""
    squeeze = x.ndim == 2
    if squeeze:
        x = x[:, :, None]
    pad = (kernel_size - 1) // 2
    xf = x.astype(jnp.float32)
    if pad > 0:
        b, _, c = xf.shape
        xf = jnp.concatenate(
            [jnp.broadcast_to(xf[:, :1, :], (b, pad, c)), xf,
             jnp.broadcast_to(xf[:, -1:, :], (b, pad, c))], axis=1)
    out_len = xf.shape[1] - kernel_size + 1
    acc = xf[:, :out_len, :]
    for j in range(1, kernel_size):
        acc = acc + xf[:, j:j + out_len, :]
    out = (acc * (1.0 / kernel_size)).astype(x.dtype)
    return out[:, :, 0] if squeeze else out


def moving_avg(x, kernel_size, stride=1, *, min_pallas_lanes=128):
    """Forward pass of the PyTorch `moving_avg` module (edge-replicate + AvgPool1d).

    Accepts x of shape (B, L) or (B, L, C); returns the same rank and dtype.
    Below `min_pallas_lanes` lanes (B*C) every store would be a masked partial
    vreg and the call is launch/step-overhead bound, so a pure-XLA path is used.
    """
    if stride != 1:
        # TODO(synk): strided AvgPool1d (stride > 1) not implemented in-kernel.
        raise NotImplementedError("only stride=1 is supported")
    kernel_size = int(kernel_size)
    if kernel_size < 1:
        raise ValueError("kernel_size must be >= 1")

    if x.ndim == 2:
        batch, seq_len = x.shape
        ch = None
    elif x.ndim == 3:
        batch, seq_len, ch = x.shape
    else:
        raise ValueError("expected a 2-D or 3-D input")

    pad = (kernel_size - 1) // 2
    p_len = seq_len + 2 * pad
    out_len = p_len - kernel_size + 1
    if out_len < 1:
        raise ValueError("sequence too short for this kernel_size")

    n = batch * (ch if ch is not None else 1)
    split_a = _choose_split(kernel_size)
    la = p_len - split_a + 1

    # Per-lane VMEM footprint of one grid step: double-buffered input/output
    # blocks plus both f32 scratch buffers.
    itemsize = jnp.dtype(x.dtype).itemsize
    per_lane = 2 * seq_len * itemsize + 2 * out_len * itemsize + 4 * (p_len + la)
    cap = _vmem_capacity_bytes()
    budget = int(cap * 0.6)

    if n < min_pallas_lanes or min(n, 128) * per_lane > budget:
        # TODO(synk): a time-tiled Pallas path (grid axis over L with a
        # (kernel_size-1) halo) would keep very long sequences on-kernel.
        return _moving_avg_xla(x, kernel_size)

    # Lane-dense fold: time on sublanes, B (or B*C) on lanes.
    if ch is None:
        x2 = jnp.transpose(x, (1, 0))                               # (L, B)
    else:
        x2 = jnp.transpose(x, (1, 0, 2)).reshape(seq_len, n)        # (L, B*C)

    tn = _pick_lane_tile(n, per_lane, budget)
    vmem_limit = min(int(cap * 0.9), tn * per_lane + (8 << 20))
    vmem_limit = max(vmem_limit, 16 << 20)

    kernel = functools.partial(
        _moving_avg_kernel, kernel_size=kernel_size, pad=pad, split_a=split_a)

    out2 = pl.pallas_call(
        kernel,
        out_shape=jax.ShapeDtypeStruct((out_len, n), x.dtype),
        grid_spec=pltpu.PrefetchScalarGridSpec(
            num_scalar_prefetch=0,
            grid=(pl.cdiv(n, tn),),
            in_specs=[pl.BlockSpec((seq_len, tn), lambda i: (0, i))],
            out_specs=pl.BlockSpec((out_len, tn), lambda i: (0, i)),
            scratch_shapes=[
                # TODO(synk): keep this scratch in bf16 on v6e/v7x when the input
                # is bf16 (halves scratch + vld traffic); left f32 for v5e safety.
                pltpu.VMEM((p_len, tn), jnp.float32),   # edge-replicated padded tile
                pltpu.VMEM((la, tn), jnp.float32),      # width-`split_a` partial sums
            ],
        ),
        compiler_params=pltpu.CompilerParams(
            dimension_semantics=("parallel",),
            vmem_limit_bytes=vmem_limit,
        ),
    )(x2)

    if ch is None:
        return jnp.transpose(out2, (1, 0))
    return jnp.transpose(out2.reshape(out_len, batch, ch), (1, 0, 2))


def _reference_moving_avg(x, kernel_size, stride=1):
    """Pure-JAX reference matching the PyTorch semantics (stride=1)."""
    squeeze_last = False
    if x.ndim == 2:
        x = x[:, :, None]
        squeeze_last = True
    pad = (kernel_size - 1) // 2
    front = jnp.repeat(x[:, 0:1, :], pad, axis=1)
    end = jnp.repeat(x[:, -1:, :], pad, axis=1)
    xp = jnp.concatenate([front, x, end], axis=1).astype(jnp.float32)
    out_len = xp.shape[1] - kernel_size + 1
    windows = jnp.stack(
        [xp[:, j:j + out_len, :] for j in range(kernel_size)], axis=0)
    out = jnp.mean(windows, axis=0).astype(x.dtype)
    if squeeze_last:
        out = out[:, :, 0]
    return out


if __name__ == "__main__":
    key = jax.random.PRNGKey(0)
    k1, k2, k3, k4, k5 = jax.random.split(key, 5)

    def _check(x, ksize, atol=1e-5, rtol=1e-5, **kw):
        y = jax.block_until_ready(moving_avg(x, ksize, **kw))
        r = _reference_moving_avg(x, ksize)
        assert y.shape == r.shape and y.dtype == x.dtype
        assert jnp.allclose(y.astype(jnp.float32), r.astype(jnp.float32),
                            atol=atol, rtol=rtol)
        return y

    # Lane-dense 3-D input (B*C = 128 lanes): the Pallas path, k=25 (DLinear-like).
    x3 = jax.random.normal(k1, (2, 96, 64), dtype=jnp.float32)
    _check(x3, 25)

    # DLinear default shape (B*C = 28 < 128): default routes to the XLA fallback...
    xdl = jax.random.normal(k2, (4, 96, 7), dtype=jnp.float32)
    _check(xdl, 25)
    # ...and the Pallas kernel is also validated on the same lane-sparse shape.
    _check(xdl, 25, min_pallas_lanes=1)

    # Even kernel_size (exercises the residual path), forced through Pallas.
    x3b = jax.random.normal(k3, (2, 16, 8), dtype=jnp.float32)
    _check(x3b, 4, min_pallas_lanes=1)

    # 2-D path, forced through Pallas.
    x2d = jax.random.normal(k4, (2, 16), dtype=jnp.float32)
    _check(x2d, 5, min_pallas_lanes=1)

    # bf16 I/O on the Pallas path (accumulation stays f32 in-kernel).
    xb = jax.random.normal(k5, (2, 16, 64), dtype=jnp.bfloat16)
    _check(xb, 5, atol=3e-2, rtol=3e-2)

    print("KERNEL_OK")
</pallas_src>

<mosaic_0001>
module attributes {stable_mosaic.version = 11 : i64} {
  func.func @_moving_avg_kernel(%arg0: i32, %arg1: memref<96x128xf32, #tpu.memory_space<vmem>>, %arg2: memref<96x128xf32, #tpu.memory_space<vmem>>, %arg3: memref<120x128xf32, #tpu.memory_space<vmem>>, %arg4: memref<113x128xf32, #tpu.memory_space<vmem>>) attributes {dimension_semantics = [#tpu.dimension_semantics<parallel>], iteration_bounds = array<i64: 1>, scalar_prefetch = 0 : i64, scratch_operands = 2 : i64, tpu.core_type = #tpu.core_type<tc>, window_params = [{transform_indices = @transform_0, window_bounds = array<i64: 96, 128>}, {transform_indices = @transform_1, window_bounds = array<i64: 96, 128>}]} {
    %c0 = arith.constant 0 : index
    %c0_0 = arith.constant 0 : index
    %0 = vector.load %arg1[%c0, %c0_0] : memref<96x128xf32, #tpu.memory_space<vmem>>, vector<96x128xf32>
    %c12 = arith.constant 12 : index
    %c0_1 = arith.constant 0 : index
    %1 = vector.load %arg3[%c12, %c0_1] : memref<120x128xf32, #tpu.memory_space<vmem>>, vector<96x128xf32>
    tpu.vector_store %arg3[%c12, %c0_1], %0 {strides = array<i32>} : memref<120x128xf32, #tpu.memory_space<vmem>>, vector<96x128xf32>,
    %c0_2 = arith.constant 0 : index
    %c0_3 = arith.constant 0 : index
    %2 = vector.load %arg1[%c0_2, %c0_3] : memref<96x128xf32, #tpu.memory_space<vmem>>, vector<1x128xf32>
    %3 = vector.shape_cast %2 : vector<1x128xf32> to vector<1x128xf32>
    %4 = vector.broadcast %3 : vector<1x128xf32> to vector<12x128xf32>
    %c0_4 = arith.constant 0 : index
    %c0_5 = arith.constant 0 : index
    %5 = vector.load %arg3[%c0_4, %c0_5] : memref<120x128xf32, #tpu.memory_space<vmem>>, vector<12x128xf32>
    tpu.vector_store %arg3[%c0_4, %c0_5], %4 {strides = array<i32>} : memref<120x128xf32, #tpu.memory_space<vmem>>, vector<12x128xf32>,
    %c95 = arith.constant 95 : index
    %c0_6 = arith.constant 0 : index
    %6 = vector.load %arg1[%c95, %c0_6] : memref<96x128xf32, #tpu.memory_space<vmem>>, vector<1x128xf32>
    %7 = vector.shape_cast %6 : vector<1x128xf32> to vector<1x128xf32>
    %8 = vector.broadcast %7 : vector<1x128xf32> to vector<12x128xf32>
    %c108 = arith.constant 108 : index
    %c0_7 = arith.constant 0 : index
    %9 = vector.load %arg3[%c108, %c0_7] : memref<120x128xf32, #tpu.memory_space<vmem>>, vector<12x128xf32>
    tpu.vector_store %arg3[%c108, %c0_7], %8 {strides = array<i32>} : memref<120x128xf32, #tpu.memory_space<vmem>>, vector<12x128xf32>,
    %c0_8 = arith.constant 0 : index
    %c0_9 = arith.constant 0 : index
    %10 = vector.load %arg3[%c0_8, %c0_9] : memref<120x128xf32, #tpu.memory_space<vmem>>, vector<113x128xf32>
    %c1 = arith.constant 1 : index
    %c0_10 = arith.constant 0 : index
    %11 = vector.load %arg3[%c1, %c0_10] : memref<120x128xf32, #tpu.memory_space<vmem>>, vector<113x128xf32>
    %12 = arith.addf %10, %11 : vector<113x128xf32>
    %c2 = arith.constant 2 : index
    %c0_11 = arith.constant 0 : index
    %13 = vector.load %arg3[%c2, %c0_11] : memref<120x128xf32, #tpu.memory_space<vmem>>, vector<113x128xf32>
    %14 = arith.addf %12, %13 : vector<113x128xf32>
    %c3 = arith.constant 3 : index
    %c0_12 = arith.constant 0 : index
    %15 = vector.load %arg3[%c3, %c0_12] : memref<120x128xf32, #tpu.memory_space<vmem>>, vector<113x128xf32>
    %16 = arith.addf %14, %15 : vector<113x128xf32>
    %c4 = arith.constant 4 : index
    %c0_13 = arith.constant 0 : index
    %17 = vector.load %arg3[%c4, %c0_13] : memref<120x128xf32, #tpu.memory_space<vmem>>, vector<113x128xf32>
    %18 = arith.addf %16, %17 : vector<113x128xf32>
    %c5 = arith.constant 5 : index
    %c0_14 = arith.constant 0 : index
    %19 = vector.load %arg3[%c5, %c0_14] : memref<120x128xf32, #tpu.memory_space<vmem>>, vector<113x128xf32>
    %20 = arith.addf %18, %19 : vector<113x128xf32>
    %c6 = arith.constant 6 : index
    %c0_15 = arith.constant 0 : index
    %21 = vector.load %arg3[%c6, %c0_15] : memref<120x128xf32, #tpu.memory_space<vmem>>, vector<113x128xf32>
    %22 = arith.addf %20, %21 : vector<113x128xf32>
    %c7 = arith.constant 7 : index
    %c0_16 = arith.constant 0 : index
    %23 = vector.load %arg3[%c7, %c0_16] : memref<120x128xf32, #tpu.memory_space<vmem>>, vector<113x128xf32>
    %24 = arith.addf %22, %23 : vector<113x128xf32>
    %c0_17 = arith.constant 0 : index
    %c0_18 = arith.constant 0 : index
    %25 = vector.load %arg4[%c0_17, %c0_18] : memref<113x128xf32, #tpu.memory_space<vmem>>, vector<113x128xf32>
    tpu.vector_store %arg4[%c0_17, %c0_18], %24 {strides = array<i32>} : memref<113x128xf32, #tpu.memory_space<vmem>>, vector<113x128xf32>,
    %c0_19 = arith.constant 0 : index
    %c0_20 = arith.constant 0 : index
    %26 = vector.load %arg4[%c0_19, %c0_20] : memref<113x128xf32, #tpu.memory_space<vmem>>, vector<96x128xf32>
    %c8 = arith.constant 8 : index
    %c0_21 = arith.constant 0 : index
    %27 = vector.load %arg4[%c8, %c0_21] : memref<113x128xf32, #tpu.memory_space<vmem>>, vector<96x128xf32>
    %28 = arith.addf %26, %27 : vector<96x128xf32>
    %c16 = arith.constant 16 : index
    %c0_22 = arith.constant 0 : index
    %29 = vector.load %arg4[%c16, %c0_22] : memref<113x128xf32, #tpu.memory_space<vmem>>, vector<96x128xf32>
    %30 = arith.addf %28, %29 : vector<96x128xf32>
    %c24 = arith.constant 24 : index
    %c0_23 = arith.constant 0 : index
    %31 = vector.load %arg3[%c24, %c0_23] : memref<120x128xf32, #tpu.memory_space<vmem>>, vector<96x128xf32>
    %32 = arith.addf %30, %31 : vector<96x128xf32>
    %cst = arith.constant 4.000000e-02 : f32
    %33 = vector.broadcast %cst : f32 to vector<96x128xf32>
    %34 = arith.mulf %32, %33 : vector<96x128xf32>
    %c0_24 = arith.constant 0 : index
    %c0_25 = arith.constant 0 : index
    %35 = vector.load %arg2[%c0_24, %c0_25] : memref<96x128xf32, #tpu.memory_space<vmem>>, vector<96x128xf32>
    tpu.vector_store %arg2[%c0_24, %c0_25], %34 {strides = array<i32>} : memref<96x128xf32, #tpu.memory_space<vmem>>, vector<96x128xf32>,
    return
  }
  func.func @transform_0(%arg0: i32) -> (i32, i32) {
    %c0_i32 = arith.constant 0 : i32
    %c0_i32_0 = arith.constant 0 : i32
    return %c0_i32, %arg0 : i32, i32
  }
  func.func @transform_1(%arg0: i32) -> (i32, i32) {
    %c0_i32 = arith.constant 0 : i32
    %c0_i32_0 = arith.constant 0 : i32
    return %c0_i32, %arg0 : i32, i32
  }
}

</mosaic_0001>

<bundles_post_ra>
// kernel: tpu_custom_call.1
= control target key start
LH: loop header
LB: loop body
LE: loop exit
PB: predicated region body
PF: predicated region fallthrough
CT: control target
= control target key end

     0   :  { %6 = vsyncpa [#allocation5], 0  ;;  %s620_s0 = inlined_call_operand.hbm [shape: f32[96,128], index: 0, kind: input, shape index: {}]   ;;  %s621_s1 = inlined_call_operand.hbm [shape: f32[96,128], index: 1, kind: output, shape index: {}]  }
   0x1   :  { %7 = vsyncpa [#allocation6], 0  ;;  %s12_s8 = sshll.u32 %s620_s0, 4  ;;  %s460_s9 = smov [#allocation4]   ;;  %s13_s8 = int_to_ptr.hbm [resolvable:$true] %s12_s8 }
   0x2   :  { %s14_s10 = sshll.u32 %s460_s9, 4  ;;  %s461_s11 = smov 128   ;;  %s15_s10 = int_to_ptr.vmem [resolvable:$true] %s14_s10 }
   0x3   :  { %s462_s12 = smov 8  }
   0x4   :  { %20 = dma.hbm_to_vmem [thread:$0]  %s13_s8, 1536, %s15_s10, [#allocation5], %s461_s11, %s461_s11, %s462_s12  }
   0x5   :  { %456 = dma.done.wait [#allocation5], 1536  }
   0x6   :  { %457 = vsyncadd [#allocation5], 4294965760  ;;  %v480_v0 = vld [vmem:[#allocation4] sm:$0xff]  ;;  %v26_v1 = vld [vmem:[#allocation4 + $0x8] sm:$0xff]  ;;  %s463_s0 = smov [#allocation7]   ;;  %s389_s16 = sshll.u32 %s621_s1, 4  ;;  %s390_s16 = int_to_ptr.hbm [resolvable:$true] %s389_s16 }
   0x7   :  { %v27_v2 = vld [vmem:[#allocation4 + $0x10] sm:$0xff]  ;;  %37 = vst [vmem:[#allocation2 + $0xc] sm:$0xff] %v480_v0  ;;  %v483_v3 = vld [vmem:[#allocation4 + $0x18] sm:$0xff]  ;;  %v485_v4 = vld [vmem:[#allocation4 + $0x20] sm:$0xff]  ;;  %s387_s13 = sshll.u32 %s463_s0, 4  ;;  %s388_s13 = int_to_ptr.vmem [resolvable:$true] %s387_s13 }
   0x8   :  { %38 = vst [vmem:[#allocation2 + $0x14] sm:$0xff] %v26_v1  ;;  %v487_v5 = vld [vmem:[#allocation4 + $0x28] sm:$0xff]  ;;  %v490_v6 = vld [vmem:[#allocation4 + $0x30] sm:$0xff]  ;;  %v493_v7 = vld [vmem:[#allocation4 + $0x38] sm:$0xff] }
   0x9   :  { %39 = vst [vmem:[#allocation2 + $0x1c] sm:$0xff] %v27_v2  ;;  %v496_v8 = vld [vmem:[#allocation4 + $0x40] sm:$0xff]  ;;  %v499_v9 = vld [vmem:[#allocation4 + $0x48] sm:$0xff]  ;;  %v502_v10 = vld [vmem:[#allocation4 + $0x50] sm:$0xff] }
   0xa   :  { %40 = vst [vmem:[#allocation2 + $0x24] sm:$0xff] %v483_v3  ;;  %v504_v11 = vld [vmem:[#allocation4 + $0x58] sm:$0xff]  ;;  %v506_v12 = vld [vmem:[#allocation4] ss:$0 sm:$0xff] }
   0xb   :  { %41 = vst [vmem:[#allocation2 + $0x2c] sm:$0xff] %v485_v4  ;;  %v511_v17 = vld [vmem:[#allocation4 + $0x5f] ss:$0 sm:$0xff] }
   0xc   :  { %42 = vst [vmem:[#allocation2 + $0x34] sm:$0xff] %v487_v5 }
   0xd   :  { %43 = vst [vmem:[#allocation2 + $0x3c] sm:$0xff] %v490_v6 }
   0xe   :  { %44 = vst [vmem:[#allocation2 + $0x44] sm:$0xff] %v493_v7 }
   0xf   :  { %45 = vst [vmem:[#allocation2 + $0x4c] sm:$0xff] %v496_v8  ;;  %v59_v13 = vld [vmem:[#allocation2 + $0x10] sm:$0xff] }
  0x10   :  { %v74_v14 = vld [vmem:[#allocation2 + $0x11] sm:$0xff]  ;;  %46 = vst [vmem:[#allocation2 + $0x54] sm:$0xff] %v499_v9  ;;  %v75_v19 = vld [vmem:[#allocation2 + $0x19] sm:$0xff] }
  0x11   :  { %v104_v15 = vld [vmem:[#allocation2 + $0x12] sm:$0xff]  ;;  %v89_v16 = vadd.f32 %v74_v14, %v59_v13  ;;  %47 = vst [vmem:[#allocation2 + $0x5c] sm:$0xff] %v502_v10  ;;  %v105_v22 = vld [vmem:[#allocation2 + $0x1a] sm:$0xff]  ;;  %v106_v28 = vld [vmem:[#allocation2 + $0x22] sm:$0xff] }
  0x12   :  { %v513_v18 = vld [vmem:[#allocation2 + $0x18] sm:$0xff]  ;;  %48 = vst [vmem:[#allocation2 + $0x64] sm:$0xff] %v504_v11  ;;  %v518_v24 = vld [vmem:[#allocation2 + $0x20] sm:$0xff]  ;;  %v524_v33 = vld [vmem:[#allocation2 + $0x28] sm:$0xff] }
  0x13   :  { %v119_v20 = vadd.f32 %v104_v15, %v89_v16  ;;  %v90_v21 = vadd.f32 %v75_v19, %v513_v18  ;;  %51 = vst [vmem:[#allocation2] sm:$0xff] %v506_v12  ;;  %v134_v23 = vld [vmem:[#allocation2 + $0x13] sm:$0xff]  ;;  %v76_v27 = vld [vmem:[#allocation2 + $0x21] sm:$0xff]  ;;  %v77_v34 = vld [vmem:[#allocation2 + $0x29] sm:$0xff] }
  0x14   :  { %52 = vst [vmem:[#allocation2 + $0x8] sm:$0xf] %v506_v12  ;;  %v135_v29 = vld [vmem:[#allocation2 + $0x1b] sm:$0xff]  ;;  %v91_v30 = vadd.f32 %v76_v27, %v518_v24  ;;  %v107_v35 = vld [vmem:[#allocation2 + $0x2a] sm:$0xff]  ;;  %v92_v38 = vadd.f32 %v77_v34, %v524_v33  ;;  %v108_v49 = vld [vmem:[#allocation2 + $0x32] sm:$0xff] }
  0x15   :  { %v149_v25 = vadd.f32 %v134_v23, %v119_v20  ;;  %v120_v26 = vadd.f32 %v105_v22, %v90_v21  ;;  %55 = vst [vmem:[#allocation2 + $0x6c] sm:$0xff] %v511_v17  ;;  %v194_v36 = vld [vmem:[#allocation2 + $0x15] sm:$0xff]  ;;  %v136_v41 = vld [vmem:[#allocation2 + $0x23] sm:$0xff]  ;;  %v137_v53 = vld [vmem:[#allocation2 + $0x2b] sm:$0xff] }
  0x16   :  { %56 = vst [vmem:[#allocation2 + $0x74] sm:$0xf] %v511_v17  ;;  %v121_v37 = vadd.f32 %v106_v28, %v91_v30  ;;  %v527_v42 = vld [vmem:[#allocation2 + $0x30] sm:$0xff]  ;;  %v195_v45 = vld [vmem:[#allocation2 + $0x1d] sm:$0xff]  ;;  %v122_v47 = vadd.f32 %v107_v35, %v92_v38  ;;  %v226_v22 = vld [vmem:[#allocation2 + $0x26] sm:$0xff] }
  0x17   :  { %v179_v31 = vadd.f32 %v149_v25, %v26_v1  ;;  %v150_v32 = vadd.f32 %v135_v29, %v120_v26  ;;  %v78_v43 = vld [vmem:[#allocation2 + $0x31] sm:$0xff]  ;;  %v225_v55 = vld [vmem:[#allocation2 + $0x1e] sm:$0xff]  ;;  %v256_v23 = vld [vmem:[#allocation2 + $0x27] sm:$0xff] }
  0x18   :  { %v224_v44 = vld [vmem:[#allocation2 + $0x16] sm:$0xff]  ;;  %v151_v46 = vadd.f32 %v136_v41, %v121_v37  ;;  %v93_v48 = vadd.f32 %v78_v43, %v527_v42  ;;  %v152_v57 = vadd.f32 %v137_v53, %v122_v47  ;;  %v255_v63 = vld [vmem:[#allocation2 + $0x1f] sm:$0xff]  ;;  %v197_v25 = vld [vmem:[#allocation2 + $0x2d] sm:$0xff] }
  0x19   :  { %v209_v39 = vadd.f32 %v194_v36, %v179_v31  ;;  %v180_v40 = vadd.f32 %v150_v32, %v27_v2  ;;  %v254_v51 = vld [vmem:[#allocation2 + $0x17] sm:$0xff]  ;;  %v196_v1 = vld [vmem:[#allocation2 + $0x25] sm:$0xff]  ;;  %v227_v34 = vld [vmem:[#allocation2 + $0x2e] sm:$0xff] }
  0x1a   :  { %v530_v54 = vld [vmem:[#allocation2 + $0x38] sm:$0xff]  ;;  %v181_v56 = vadd.f32 %v151_v46, %v483_v3  ;;  %v123_v58 = vadd.f32 %v108_v49, %v93_v48  ;;  %v182_v15 = vadd.f32 %v152_v57, %v485_v4  ;;  %v537_v19 = vld [vmem:[#allocation2 + $0x40] sm:$0xff]  ;;  %v543_v32 = vld [vmem:[#allocation2 + $0x48] sm:$0xff] }
  0x1b   :  { %v239_v50 = vadd.f32 %v224_v44, %v209_v39  ;;  %v210_v52 = vadd.f32 %v195_v45, %v180_v40  ;;  %v79_v59 = vld [vmem:[#allocation2 + $0x39] sm:$0xff]  ;;  %v80_v20 = vld [vmem:[#allocation2 + $0x41] sm:$0xff]  ;;  %v81_v4 = vld [vmem:[#allocation2 + $0x49] sm:$0xff] }
  0x1c   :  { %v109_v60 = vld [vmem:[#allocation2 + $0x3a] sm:$0xff]  ;;  %v94_v13 = vadd.f32 %v79_v59, %v530_v54  ;;  %v211_v14 = vadd.f32 %v196_v1, %v181_v56  ;;  %v110_v3 = vld [vmem:[#allocation2 + $0x42] sm:$0xff]  ;;  %v95_v27 = vadd.f32 %v80_v20, %v537_v19  ;;  %v212_v29 = vadd.f32 %v197_v25, %v182_v15  ;;  %v111_v39 = vld [vmem:[#allocation2 + $0x4a] sm:$0xff] }
  0x1d   :  { %v533_v61 = vadd.f32 %v254_v51, %v239_v50  ;;  %v240_v62 = vadd.f32 %v225_v55, %v210_v52  ;;  %v138_v2 = vld [vmem:[#allocation2 + $0x33] sm:$0xff]  ;;  %v139_v31 = vld [vmem:[#allocation2 + $0x3b] sm:$0xff]  ;;  %v96_v38 = vadd.f32 %v81_v4, %v543_v32  ;;  %v230_v4 = vld [vmem:[#allocation2 + $0x46] sm:$0xff] }
  0x1e   :  { %v153_v16 = vadd.f32 %v138_v2, %v123_v58  ;;  %v124_v26 = vadd.f32 %v109_v60, %v94_v13  ;;  %v241_v28 = vadd.f32 %v226_v22, %v211_v14  ;;  %v198_v35 = vld [vmem:[#allocation2 + $0x35] sm:$0xff]  ;;  %v125_v37 = vadd.f32 %v110_v3, %v95_v27  ;;  %v199_v57 = vld [vmem:[#allocation2 + $0x3d] sm:$0xff]  ;;  %v141_v58 = vld [vmem:[#allocation2 + $0x4b] sm:$0xff] }
  0x1f   :  { %v539_v21 = vadd.f32 %v255_v63, %v240_v62  ;;  %v242_v43 = vadd.f32 %v227_v34, %v212_v29  ;;  %v257_v44 = vld [vmem:[#allocation2 + $0x2f] sm:$0xff]  ;;  %v126_v50 = vadd.f32 %v111_v39, %v96_v38  ;;  %v258_v56 = vld [vmem:[#allocation2 + $0x37] sm:$0xff]  ;;  %v259_v20 = vld [vmem:[#allocation2 + $0x3f] sm:$0xff] }
  0x20   :  { %v183_v30 = vadd.f32 %v153_v16, %v487_v5  ;;  %v154_v36 = vadd.f32 %v139_v31, %v124_v26  ;;  %v548_v41 = vadd.f32 %v256_v23, %v241_v28  ;;  %v140_v5 = vld [vmem:[#allocation2 + $0x43] sm:$0xff]  ;;  %v550_v46 = vld [vmem:[#allocation2 + $0x50] sm:$0xff]  ;;  %v558_v2 = vld [vmem:[#allocation2 + $0x58] sm:$0xff] }
  0x21   :  { %v312_v40 = vadd.f32 %v539_v21, %v533_v61  ;;  %v228_v47 = vld [vmem:[#allocation2 + $0x36] sm:$0xff]  ;;  %v155_v49 = vadd.f32 %v140_v5, %v125_v37  ;;  %v553_v53 = vadd.f32 %v257_v44, %v242_v43  ;;  %v156_v1 = vadd.f32 %v141_v58, %v126_v50  ;;  %v229_v16 = vld [vmem:[#allocation2 + $0x3e] sm:$0xff]  ;;  %v201_v34 = vld [vmem:[#allocation2 + $0x4d] sm:$0xff] }
  0x22   :  { %v213_v45 = vadd.f32 %v198_v35, %v183_v30  ;;  %v184_v48 = vadd.f32 %v154_v36, %v490_v6  ;;  %v82_v51 = vld [vmem:[#allocation2 + $0x51] sm:$0xff]  ;;  %v83_v6 = vld [vmem:[#allocation2 + $0x59] sm:$0xff]  ;;  %v313_v14 = vadd.f32 %v548_v41, %v539_v21  ;;  %v200_v3 = vld [vmem:[#allocation2 + $0x45] sm:$0xff] }
  0x23   :  { %v112_v52 = vld [vmem:[#allocation2 + $0x52] sm:$0xff]  ;;  %v97_v59 = vadd.f32 %v82_v51, %v550_v46  ;;  %v325_v60 = vadd.f32 %v312_v40, %v548_v41  ;;  %v185_v63 = vadd.f32 %v155_v49, %v493_v7  ;;  %v113_v13 = vld [vmem:[#allocation2 + $0x5a] sm:$0xff]  ;;  %v98_v23 = vadd.f32 %v83_v6, %v558_v2  ;;  %v114_v38 = vld [vmem:[#allocation2 + $0x62] sm:$0xff] }
  0x24   :  { %v243_v55 = vadd.f32 %v228_v47, %v213_v45  ;;  %v214_v62 = vadd.f32 %v199_v57, %v184_v48  ;;  %v186_v27 = vadd.f32 %v156_v1, %v496_v8  ;;  %v142_v28 = vld [vmem:[#allocation2 + $0x53] sm:$0xff]  ;;  %v567_v29 = vld [vmem:[#allocation2 + $0x60] sm:$0xff]  ;;  %v326_v31 = vadd.f32 %v313_v14, %v553_v53  ;;  %v73_v14 = vld [vmem:[#allocation2 + $0x9] sm:$0xff] }
  0x25   :  { %v127_v22 = vadd.f32 %v112_v52, %v97_v59  ;;  %v349_v25 = vadd.f32 %v325_v60, %v524_v33  ;;  %v215_v7 = vadd.f32 %v200_v3, %v185_v63  ;;  %v84_v30 = vld [vmem:[#allocation2 + $0x61] sm:$0xff]  ;;  %v128_v36 = vadd.f32 %v113_v13, %v98_v23  ;;  %v231_v47 = vld [vmem:[#allocation2 + $0x4e] sm:$0xff]  ;;  %v232_v63 = vld [vmem:[#allocation2 + $0x56] sm:$0xff] }
  0x26   :  { %v562_v15 = vadd.f32 %v258_v56, %v243_v55  ;;  %v244_v26 = vadd.f32 %v229_v16, %v214_v62  ;;  %v99_v37 = vadd.f32 %v84_v30, %v567_v29  ;;  %v216_v43 = vadd.f32 %v201_v34, %v186_v27  ;;  %v143_v44 = vld [vmem:[#allocation2 + $0x5b] sm:$0xff]  ;;  %v260_v5 = vld [vmem:[#allocation2 + $0x47] sm:$0xff]  ;;  %v261_v48 = vld [vmem:[#allocation2 + $0x4f] sm:$0xff] }
  0x27   :  { %v157_v35 = vadd.f32 %v142_v28, %v127_v22  ;;  %v361_v39 = vmul.f32 0.04, %v349_v25  ;;  %v245_v33 = vadd.f32 %v230_v4, %v215_v7  ;;  %v72_v8 = vld [vmem:[#allocation2 + $0x1] sm:$0xff]  ;;  %v350_v45 = vadd.f32 %v326_v31, %v527_v42  ;;  %v202_v57 = vld [vmem:[#allocation2 + $0x55] sm:$0xff]  ;;  %v103_v28 = vld [vmem:[#allocation2 + $0xa] sm:$0xff] }
  0x28   :  { %v571_v40 = vadd.f32 %v259_v20, %v244_v26  ;;  %v158_v50 = vadd.f32 %v143_v44, %v128_v36  ;;  %v129_v51 = vadd.f32 %v114_v38, %v99_v37  ;;  %v87_v52 = vadd.f32 %v506_v12, %v72_v8  ;;  %v144_v58 = vld [vmem:[#allocation2 + $0x63] sm:$0xff]  ;;  %v262_v16 = vld [vmem:[#allocation2 + $0x57] sm:$0xff]  ;;  %v133_v8 = vld [vmem:[#allocation2 + $0xb] sm:$0xff] }
  0x29   :  { %v187_v49 = vadd.f32 %v157_v35, %v499_v9  ;;  %373 = vst [vmem:[#allocation7 + $0x10] sm:$0xff] %v361_v39  ;;  %v576_v55 = vadd.f32 %v260_v5, %v245_v33  ;;  %v246_v56 = vadd.f32 %v231_v47, %v216_v43  ;;  %v102_v59 = vld [vmem:[#allocation2 + $0x2] sm:$0xff]  ;;  %v362_v60 = vmul.f32 0.04, %v350_v45  ;;  %v115_v45 = vld [vmem:[#allocation2 + $0x6a] sm:$0xff] }
  0x2a   :  { %v314_v42 = vadd.f32 %v553_v53, %v548_v41  ;;  %v188_v1 = vadd.f32 %v158_v50, %v502_v10  ;;  %v159_v9 = vadd.f32 %v144_v58, %v129_v51  ;;  %v117_v6 = vadd.f32 %v102_v59, %v87_v52  ;;  %v58_v13 = vld [vmem:[#allocation2 + $0x8] sm:$0xff]  ;;  %v203_v20 = vld [vmem:[#allocation2 + $0x5d] sm:$0xff] }
  0x2b   :  { %v217_v62 = vadd.f32 %v202_v57, %v187_v49  ;;  %v581_v12 = vadd.f32 %v261_v48, %v246_v56  ;;  %v233_v3 = vld [vmem:[#allocation2 + $0x5e] sm:$0xff]  ;;  %v88_v23 = vadd.f32 %v73_v14, %v58_v13  ;;  %v315_v41 = vadd.f32 %v562_v15, %v553_v53  ;;  %v587_v30 = vld [vmem:[#allocation2 + $0x68] sm:$0xff]  ;;  %374 = vst [vmem:[#allocation7 + $0x18] sm:$0xff] %v362_v60 }
  0x2c   :  { %v132_v22 = vld [vmem:[#allocation2 + $0x3] sm:$0xff]  ;;  %v327_v25 = vadd.f32 %v314_v42, %v562_v15  ;;  %v218_v7 = vadd.f32 %v203_v20, %v188_v1  ;;  %v189_v10 = vadd.f32 %v159_v9, %v504_v11  ;;  %v316_v50 = vadd.f32 %v571_v40, %v562_v15  ;;  %v193_v9 = vld [vmem:[#allocation2 + $0xd] sm:$0xff] }
  0x2d   :  { %v247_v26 = vadd.f32 %v232_v63, %v217_v62  ;;  %v147_v27 = vadd.f32 %v132_v22, %v117_v6  ;;  %v85_v31 = vld [vmem:[#allocation2 + $0x69] sm:$0xff]  ;;  %v263_v4 = vld [vmem:[#allocation2 + $0x5f] sm:$0xff]  ;;  %v118_v37 = vadd.f32 %v103_v28, %v88_v23  ;;  %v328_v53 = vadd.f32 %v315_v41, %v571_v40 }
  0x2e   :  { %v204_v34 = vld [vmem:[#allocation2 + $0x65] sm:$0xff]  ;;  %v100_v38 = vadd.f32 %v85_v31, %v587_v30  ;;  %v351_v39 = vadd.f32 %v327_v25, %v530_v54  ;;  %v248_v43 = vadd.f32 %v233_v3, %v218_v7  ;;  %v329_v62 = vadd.f32 %v316_v50, %v576_v55  ;;  %v205_v3 = vld [vmem:[#allocation2 + $0x6d] sm:$0xff] }
  0x2f   :  { %v234_v35 = vld [vmem:[#allocation2 + $0x66] sm:$0xff]  ;;  %v277_v33 = vadd.f32 %v262_v16, %v247_v26  ;;  %v219_v11 = vadd.f32 %v204_v34, %v189_v10  ;;  %v148_v47 = vadd.f32 %v133_v8, %v118_v37  ;;  %v352_v49 = vadd.f32 %v328_v53, %v537_v19  ;;  %v253_v7 = vld [vmem:[#allocation2 + $0xf] sm:$0xff] }
  0x30   :  { %v162_v36 = vld [vmem:[#allocation2 + $0x4] sm:$0xff]  ;;  %v130_v48 = vadd.f32 %v115_v45, %v100_v38  ;;  %v278_v51 = vadd.f32 %v263_v4, %v248_v43  ;;  %v363_v42 = vmul.f32 0.04, %v351_v39  ;;  %v353_v14 = vadd.f32 %v329_v62, %v543_v32  ;;  %v235_v10 = vld [vmem:[#allocation2 + $0x6e] sm:$0xff] }
  0x31   :  { %v177_v44 = vadd.f32 %v162_v36, %v147_v27  ;;  %v192_v5 = vld [vmem:[#allocation2 + $0x5] sm:$0xff]  ;;  %v249_v52 = vadd.f32 %v234_v35, %v219_v11  ;;  %v178_v59 = vadd.f32 %v148_v47, %v480_v0  ;;  %v364_v6 = vmul.f32 0.04, %v352_v49  ;;  %v223_v0 = vld [vmem:[#allocation2 + $0xe] sm:$0xff] }
  0x32   :  { %v145_v54 = vld [vmem:[#allocation2 + $0x6b] sm:$0xff]  ;;  %375 = vst [vmem:[#allocation7 + $0x20] sm:$0xff] %v363_v42  ;;  %v317_v16 = vadd.f32 %v576_v55, %v571_v40  ;;  %v318_v22 = vadd.f32 %v581_v12, %v576_v55  ;;  %v319_v23 = vadd.f32 %v277_v33, %v581_v12  ;;  %v365_v26 = vmul.f32 0.04, %v353_v14 }
  0x33   :  { %v207_v56 = vadd.f32 %v192_v5, %v177_v44  ;;  %v264_v57 = vld [vmem:[#allocation2 + $0x67] sm:$0xff]  ;;  %v160_v60 = vadd.f32 %v145_v54, %v130_v48  ;;  %v208_v13 = vadd.f32 %v193_v9, %v178_v59  ;;  %376 = vst [vmem:[#allocation7 + $0x28] sm:$0xff] %v364_v6  ;;  %v320_v28 = vadd.f32 %v278_v51, %v277_v33  ;;  %v265_v55 = vld [vmem:[#allocation2 + $0x6f] sm:$0xff] }
  0x34   :  { %v222_v58 = vld [vmem:[#allocation2 + $0x6] sm:$0xff]  ;;  %v279_v63 = vadd.f32 %v264_v57, %v249_v52  ;;  %v331_v32 = vadd.f32 %v318_v22, %v277_v33  ;;  %v332_v27 = vadd.f32 %v319_v23, %v278_v51  ;;  %377 = vst [vmem:[#allocation7 + $0x30] sm:$0xff] %v365_v26 }
  0x35   :  { %v237_v1 = vadd.f32 %v222_v58, %v207_v56  ;;  %v252_v19 = vld [vmem:[#allocation2 + $0x7] sm:$0xff]  ;;  %v190_v15 = vadd.f32 %v511_v17, %v160_v60  ;;  %v238_v25 = vadd.f32 %v223_v0, %v208_v13  ;;  %v330_v17 = vadd.f32 %v317_v16, %v581_v12 }
  0x36   :  { %v321_v34 = vadd.f32 %v279_v63, %v278_v51  ;;  %v355_v35 = vadd.f32 %v331_v32, %v558_v2  ;;  %v356_v36 = vadd.f32 %v332_v27, %v567_v29  ;;  %v333_v37 = vadd.f32 %v320_v28, %v279_v63  ;;  %v346_v2 = vld [vmem:[#allocation2 + $0x70] sm:$0xff] }
  0x37   :  { %v267_v20 = vadd.f32 %v252_v19, %v237_v1  ;;  %v220_v41 = vadd.f32 %v205_v3, %v190_v15  ;;  %v268_v40 = vadd.f32 %v253_v7, %v238_v25  ;;  %v354_v4 = vadd.f32 %v330_v17, %v550_v46 }
  0x38   :  { %v367_v43 = vmul.f32 0.04, %v355_v35  ;;  %v357_v33 = vadd.f32 %v333_v37, %v587_v30  ;;  %v368_v11 = vmul.f32 0.04, %v356_v36 }
  0x39   :  { %v250_v31 = vadd.f32 %v235_v10, %v220_v41  ;;  %v366_v39 = vmul.f32 0.04, %v354_v4  ;;  %v310_v12 = vadd.f32 %v268_v40, %v267_v20  ;;  %v311_v53 = vadd.f32 %v533_v61, %v268_v40 }
  0x3a   :  { %v369_v45 = vmul.f32 0.04, %v357_v33  ;;  %379 = vst [vmem:[#allocation7 + $0x40] sm:$0xff] %v367_v43 }
  0x3b   :  { %v280_v38 = vadd.f32 %v265_v55, %v250_v31  ;;  %v323_v8 = vadd.f32 %v310_v12, %v533_v61  ;;  %v324_v46 = vadd.f32 %v311_v53, %v539_v21  ;;  %378 = vst [vmem:[#allocation7 + $0x38] sm:$0xff] %v366_v39 }
  0x3c   :  { %380 = vst [vmem:[#allocation7 + $0x48] sm:$0xff] %v368_v11 }
  0x3d   :  { %v334_v44 = vadd.f32 %v321_v34, %v280_v38  ;;  %v347_v5 = vadd.f32 %v323_v8, %v513_v18  ;;  %v348_v47 = vadd.f32 %v324_v46, %v518_v24  ;;  %381 = vst [vmem:[#allocation7 + $0x50] sm:$0xff] %v369_v45 }
  0x3f   :  { %v358_v29 = vadd.f32 %v346_v2, %v334_v44  ;;  %v359_v61 = vmul.f32 0.04, %v347_v5  ;;  %v360_v21 = vmul.f32 0.04, %v348_v47 }
  0x41   :  { %v370_v30 = vmul.f32 0.04, %v358_v29  ;;  %371 = vst [vmem:[#allocation7] sm:$0xff] %v359_v61 }
  0x42   :  { %372 = vst [vmem:[#allocation7 + $0x8] sm:$0xff] %v360_v21 }
  0x43   :  { %382 = vst [vmem:[#allocation7 + $0x58] sm:$0xff] %v370_v30 }
  0x44   :  { %395 = dma.vmem_to_hbm [thread:$0]  %s388_s13, 1536, %s390_s16, [#allocation6], %s461_s11, %s461_s11, %s462_s12  }
  0x45   :  { %458 = dma.done.wait [#allocation6], 1536  }
  0x46   :  { %459 = vsyncadd [#allocation6], 4294965760 }
  0x47   :  { %400 = vsyncpa [#allocation5], 1 }
  0x48   :  { %401 = vsyncpa [#allocation6], 1 }

</bundles_post_ra>
